<compile_context>
chip_gen: v7x
topology: tpu7x:2x2x1
jax: 0.10.0
libtpu: 0.0.40
codegen_flags: <defaults>
</compile_context>

<pallas_src>
import functools

import jax
import jax.numpy as jnp
from jax.experimental import pallas as pl
from jax.experimental.pallas import tpu as pltpu


def _round_up(n, m):
    return ((n + m - 1) // m) * m


def _sigmoid_tanh(h):
    # sigmoid(h) == 0.5 * (tanh(0.5 * h) + 1): one EUP transcendental; the
    # 0.5 mul / +1 land on the VPU, which has slack.
    return 0.5 * (jnp.tanh(0.5 * h) + 1.0)


def soft_q_kernel(x_ref, w1_ref, b1_ref, w2_ref, b2_ref, w3_ref, b3_ref,
                  out_ref, *, act_dtype):
    x = x_ref[...]                                    # (tile_b, 4) f32

    # ---- fc1 on the VPU: unrolled K=4 broadcast FMAs (MXU would pad K 4->128) ----
    w1 = w1_ref[...]                                  # (4, 64) f32
    h1 = b1_ref[...]                                  # (1, 64) broadcasts over rows
    h1 = h1 + x[:, 0:1] * w1[0:1, :]
    h1 = h1 + x[:, 1:2] * w1[1:2, :]
    h1 = h1 + x[:, 2:3] * w1[2:3, :]
    h1 = h1 + x[:, 3:4] * w1[3:4, :]
    h1 = _sigmoid_tanh(h1.astype(act_dtype))          # (tile_b, 64)

    # ---- fc2 on the MXU, f32 accumulation (weights pre-cast in the wrapper) ----
    h2 = jnp.dot(h1.astype(w2_ref.dtype), w2_ref[...],
                 preferred_element_type=jnp.float32)  # (tile_b, 256) f32
    h2 = _sigmoid_tanh((h2 + b2_ref[...]).astype(act_dtype))

    # ---- fc3 on the MXU into a narrow (tile_b, A_pad) block (A_pad ~ 8) ----
    q = jnp.dot(h2.astype(w3_ref.dtype), w3_ref[...],
                preferred_element_type=jnp.float32)   # (tile_b, A_pad) f32
    out_ref[...] = (q + b3_ref[...]).astype(out_ref.dtype)


def soft_q_forward(x, params, *, tile_b=2048, use_bf16=True, mxu_bf16=False,
                   out_dtype=jnp.float32):
    """Forward pass of SoftQNetwork.

    x: (B, 4) float32.  params: dict of w1,b1,w2,b2,w3,b3 with w: (in, out).

    use_bf16=True  -> bf16 activations + bf16 MXU operands (v6e / v7x default).
    use_bf16=False, mxu_bf16=True  -> f32 VPU/EUP, bf16 MXU operands (v5e).
    use_bf16=False, mxu_bf16=False -> exact f32 path (accuracy reference).
    Accumulation is always f32.
    """
    w1, b1 = params["w1"], params["b1"]
    w2, b2 = params["w2"], params["b2"]
    w3, b3 = params["w3"], params["b3"]

    B, F = x.shape
    A = w3.shape[1]

    act_dtype = jnp.bfloat16 if use_bf16 else jnp.float32
    mxu_dtype = jnp.bfloat16 if (use_bf16 or mxu_bf16) else jnp.float32

    # Narrow fc3 output: pad only to 8 columns (full last dim of the output
    # array -> legal block, masked vst, ~16x less HBM writeback than 128).
    A_pad = _round_up(max(A, 1), 8)
    w3p = jnp.zeros((w3.shape[0], A_pad), mxu_dtype).at[:, :A].set(
        w3.astype(mxu_dtype))
    b3p = jnp.zeros((1, A_pad), jnp.float32).at[:, :A].set(
        b3.reshape(1, -1).astype(jnp.float32))

    # Pre-cast MXU weights once in the wrapper (no per-step in-kernel casts).
    w2c = w2.astype(mxu_dtype)
    b1f = b1.reshape(1, -1).astype(jnp.float32)
    b2f = b2.reshape(1, -1).astype(jnp.float32)
    w1f = w1.astype(jnp.float32)

    # Batch tiling: big tiles to amortize per-step overhead; even number of
    # >=2 tiles when the batch is large enough (keeps v7x's 2 TCs busy).
    tile_b = max(8, min(int(tile_b), _round_up(B, 8)))
    num_tiles = -(-B // tile_b)
    if num_tiles == 1 and B >= 2048:
        num_tiles = 2
    elif num_tiles > 1 and num_tiles % 2 == 1:
        num_tiles += 1
    tile_b = _round_up(-(-B // num_tiles), 8)
    B_pad = tile_b * num_tiles
    if B_pad != B:
        x = jnp.pad(x, ((0, B_pad - B), (0, 0)))   # padded rows dropped below

    grid = (num_tiles,)

    def const2d(arr):  # weights/biases: same block every grid step -> VMEM-resident
        return pl.BlockSpec(arr.shape, lambda i: (0, 0))

    # Advisory cost estimate for XLA's scheduler.
    weight_bytes = (w1f.size + b1f.size + b2f.size + b3p.size) * 4 \
        + (w2c.size + w3p.size) * jnp.dtype(mxu_dtype).itemsize
    cost = pl.CostEstimate(
        flops=2 * B_pad * (F * 64 + 64 * 256 + 256 * A_pad),
        transcendentals=B_pad * (64 + 256),
        bytes_accessed=B_pad * (F * 4 + A_pad * jnp.dtype(out_dtype).itemsize)
        + weight_bytes,
    )

    out = pl.pallas_call(
        functools.partial(soft_q_kernel, act_dtype=act_dtype),
        out_shape=jax.ShapeDtypeStruct((B_pad, A_pad), out_dtype),
        grid=grid,
        in_specs=[
            pl.BlockSpec((tile_b, F), lambda i: (i, 0)),   # x streamed over batch
            const2d(w1f), const2d(b1f),
            const2d(w2c), const2d(b2f),
            const2d(w3p), const2d(b3p),
        ],
        out_specs=pl.BlockSpec((tile_b, A_pad), lambda i: (i, 0)),
        compiler_params=pltpu.CompilerParams(
            dimension_semantics=("parallel",),   # batch tiles shard across TCs
            vmem_limit_bytes=32 << 20,           # safe on v5e/v6e/v7x
        ),
        cost_estimate=cost,
    )(x, w1f, b1f, w2c, b2f, w3p, b3p)

    return out[:B, :A]


def init_params(key, num_actions):
    """Deterministic init mimicking nn.Linear's default uniform(-1/sqrt(fan_in), +)."""
    dims = [(4, 64), (64, 256), (256, num_actions)]
    params = {}
    for idx, (fan_in, fan_out) in enumerate(dims, start=1):
        key, kw, kb = jax.random.split(key, 3)
        bound = 1.0 / jnp.sqrt(jnp.float32(fan_in))
        params[f"w{idx}"] = jax.random.uniform(
            kw, (fan_in, fan_out), jnp.float32, -bound, bound)
        # keep biases 2D (1, out) so they broadcast cleanly inside the kernel
        params[f"b{idx}"] = jax.random.uniform(
            kb, (1, fan_out), jnp.float32, -bound, bound)
    return params


def reference_forward(x, params):
    h1 = jax.nn.sigmoid(x @ params["w1"] + params["b1"])
    h2 = jax.nn.sigmoid(h1 @ params["w2"] + params["b2"])
    return h2 @ params["w3"] + params["b3"]


if __name__ == "__main__":
    key = jax.random.PRNGKey(0)
    num_actions = 6
    batch = 8  # small demo batch; kernel is designed to pay off at large batch

    kp, kx = jax.random.split(key)
    params = init_params(kp, num_actions)
    x = jax.random.normal(kx, (batch, 4), jnp.float32)

    q_ref = reference_forward(x, params)

    # Exact f32 path (reference accuracy on all generations).
    q_f32 = jax.block_until_ready(
        soft_q_forward(x, params, use_bf16=False, mxu_bf16=False))
    assert q_f32.shape == (batch, num_actions)
    assert jnp.allclose(q_f32, q_ref, atol=1e-4, rtol=1e-4), "f32 path mismatch"

    # Default bf16 path (v6e / v7x): bf16 activations + bf16 MXU, f32 accumulate.
    q_bf16 = jax.block_until_ready(soft_q_forward(x, params))
    assert jnp.allclose(q_bf16, q_ref, atol=5e-2, rtol=5e-2), "bf16 path mismatch"

    # v5e-friendly path: f32 VPU/EUP, bf16 MXU operands only.
    q_v5e = jax.block_until_ready(
        soft_q_forward(x, params, use_bf16=False, mxu_bf16=True))
    assert jnp.allclose(q_v5e, q_ref, atol=5e-2, rtol=5e-2), "bf16-MXU path mismatch"

    print("KERNEL_OK")
</pallas_src>

<mosaic_0001>
module attributes {stable_mosaic.version = 11 : i64} {
  func.func @soft_q_kernel(%arg0: i32, %arg1: memref<8x4xf32, #tpu.memory_space<vmem>>, %arg2: memref<4x64xf32, #tpu.memory_space<vmem>>, %arg3: memref<1x64xf32, #tpu.memory_space<vmem>>, %arg4: memref<64x256xf32, #tpu.memory_space<vmem>>, %arg5: memref<1x256xf32, #tpu.memory_space<vmem>>, %arg6: memref<256x8xf32, #tpu.memory_space<vmem>>, %arg7: memref<1x8xf32, #tpu.memory_space<vmem>>, %arg8: memref<8x8xf32, #tpu.memory_space<vmem>>) attributes {dimension_semantics = [#tpu.dimension_semantics<parallel>], iteration_bounds = array<i64: 1>, scalar_prefetch = 0 : i64, scratch_operands = 0 : i64, tpu.core_type = #tpu.core_type<tc>, window_params = [{transform_indices = @transform_0, window_bounds = array<i64: 8, 4>}, {pipeline_mode = #tpu.pipeline_mode<synchronous>, transform_indices = @transform_1, window_bounds = array<i64: 4, 64>}, {pipeline_mode = #tpu.pipeline_mode<synchronous>, transform_indices = @transform_2, window_bounds = array<i64: 1, 64>}, {pipeline_mode = #tpu.pipeline_mode<synchronous>, transform_indices = @transform_3, window_bounds = array<i64: 64, 256>}, {pipeline_mode = #tpu.pipeline_mode<synchronous>, transform_indices = @transform_4, window_bounds = array<i64: 1, 256>}, {pipeline_mode = #tpu.pipeline_mode<synchronous>, transform_indices = @transform_5, window_bounds = array<i64: 256, 8>}, {pipeline_mode = #tpu.pipeline_mode<synchronous>, transform_indices = @transform_6, window_bounds = array<i64: 1, 8>}, {transform_indices = @transform_7, window_bounds = array<i64: 8, 8>}]} {
    %c0 = arith.constant 0 : index
    %c0_0 = arith.constant 0 : index
    %0 = vector.load %arg1[%c0, %c0_0] : memref<8x4xf32, #tpu.memory_space<vmem>>, vector<8x4xf32>
    %c0_1 = arith.constant 0 : index
    %c0_2 = arith.constant 0 : index
    %1 = vector.load %arg2[%c0_1, %c0_2] : memref<4x64xf32, #tpu.memory_space<vmem>>, vector<4x64xf32>
    %c0_3 = arith.constant 0 : index
    %c0_4 = arith.constant 0 : index
    %2 = vector.load %arg3[%c0_3, %c0_4] : memref<1x64xf32, #tpu.memory_space<vmem>>, vector<1x64xf32>
    %3 = vector.extract_strided_slice %0 {offsets = [0, 0], sizes = [8, 1], strides = [1, 1]} : vector<8x4xf32> to vector<8x1xf32>
    %4 = vector.extract_strided_slice %1 {offsets = [0, 0], sizes = [1, 64], strides = [1, 1]} : vector<4x64xf32> to vector<1x64xf32>
    %5 = vector.broadcast %3 : vector<8x1xf32> to vector<8x64xf32>
    %6 = vector.broadcast %4 : vector<1x64xf32> to vector<8x64xf32>
    %7 = arith.mulf %5, %6 : vector<8x64xf32>
    %8 = vector.broadcast %2 : vector<1x64xf32> to vector<8x64xf32>
    %9 = arith.addf %8, %7 : vector<8x64xf32>
    %10 = vector.extract_strided_slice %0 {offsets = [0, 1], sizes = [8, 1], strides = [1, 1]} : vector<8x4xf32> to vector<8x1xf32>
    %11 = vector.extract_strided_slice %1 {offsets = [1, 0], sizes = [1, 64], strides = [1, 1]} : vector<4x64xf32> to vector<1x64xf32>
    %12 = vector.broadcast %10 : vector<8x1xf32> to vector<8x64xf32>
    %13 = vector.broadcast %11 : vector<1x64xf32> to vector<8x64xf32>
    %14 = arith.mulf %12, %13 : vector<8x64xf32>
    %15 = arith.addf %9, %14 : vector<8x64xf32>
    %16 = vector.extract_strided_slice %0 {offsets = [0, 2], sizes = [8, 1], strides = [1, 1]} : vector<8x4xf32> to vector<8x1xf32>
    %17 = vector.extract_strided_slice %1 {offsets = [2, 0], sizes = [1, 64], strides = [1, 1]} : vector<4x64xf32> to vector<1x64xf32>
    %18 = vector.broadcast %16 : vector<8x1xf32> to vector<8x64xf32>
    %19 = vector.broadcast %17 : vector<1x64xf32> to vector<8x64xf32>
    %20 = arith.mulf %18, %19 : vector<8x64xf32>
    %21 = arith.addf %15, %20 : vector<8x64xf32>
    %22 = vector.extract_strided_slice %0 {offsets = [0, 3], sizes = [8, 1], strides = [1, 1]} : vector<8x4xf32> to vector<8x1xf32>
    %23 = vector.extract_strided_slice %1 {offsets = [3, 0], sizes = [1, 64], strides = [1, 1]} : vector<4x64xf32> to vector<1x64xf32>
    %24 = vector.broadcast %22 : vector<8x1xf32> to vector<8x64xf32>
    %25 = vector.broadcast %23 : vector<1x64xf32> to vector<8x64xf32>
    %26 = arith.mulf %24, %25 : vector<8x64xf32>
    %27 = arith.addf %21, %26 : vector<8x64xf32>
    %cst = arith.constant 5.000000e-01 : f32
    %28 = vector.broadcast %cst : f32 to vector<8x64xf32>
    %29 = arith.mulf %28, %27 : vector<8x64xf32>
    %30 = math.tanh %29 : vector<8x64xf32>
    %cst_5 = arith.constant 1.000000e+00 : f32
    %31 = vector.broadcast %cst_5 : f32 to vector<8x64xf32>
    %32 = arith.addf %30, %31 : vector<8x64xf32>
    %cst_6 = arith.constant 5.000000e-01 : f32
    %33 = vector.broadcast %cst_6 : f32 to vector<8x64xf32>
    %34 = arith.mulf %33, %32 : vector<8x64xf32>
    %c0_7 = arith.constant 0 : index
    %c0_8 = arith.constant 0 : index
    %35 = vector.load %arg4[%c0_7, %c0_8] : memref<64x256xf32, #tpu.memory_space<vmem>>, vector<64x256xf32>
    %cst_9 = arith.constant dense<0.000000e+00> : vector<8x256xf32>
    %36 = tpu.matmul %34, %35, %cst_9 {dimension_numbers = #tpu.dot_dimension_numbers<[1], [0], [0], [1], [0, 0, 1, 1], [], []>} : vector<8x64xf32>, vector<64x256xf32>, vector<8x256xf32> -> vector<8x256xf32>
    %c0_10 = arith.constant 0 : index
    %c0_11 = arith.constant 0 : index
    %37 = vector.load %arg5[%c0_10, %c0_11] : memref<1x256xf32, #tpu.memory_space<vmem>>, vector<1x256xf32>
    %38 = vector.broadcast %37 : vector<1x256xf32> to vector<8x256xf32>
    %39 = arith.addf %36, %38 : vector<8x256xf32>
    %cst_12 = arith.constant 5.000000e-01 : f32
    %40 = vector.broadcast %cst_12 : f32 to vector<8x256xf32>
    %41 = arith.mulf %40, %39 : vector<8x256xf32>
    %42 = math.tanh %41 : vector<8x256xf32>
    %cst_13 = arith.constant 1.000000e+00 : f32
    %43 = vector.broadcast %cst_13 : f32 to vector<8x256xf32>
    %44 = arith.addf %42, %43 : vector<8x256xf32>
    %cst_14 = arith.constant 5.000000e-01 : f32
    %45 = vector.broadcast %cst_14 : f32 to vector<8x256xf32>
    %46 = arith.mulf %45, %44 : vector<8x256xf32>
    %c0_15 = arith.constant 0 : index
    %c0_16 = arith.constant 0 : index
    %47 = vector.load %arg6[%c0_15, %c0_16] : memref<256x8xf32, #tpu.memory_space<vmem>>, vector<256x8xf32>
    %cst_17 = arith.constant dense<0.000000e+00> : vector<8x8xf32>
    %48 = tpu.matmul %46, %47, %cst_17 {dimension_numbers = #tpu.dot_dimension_numbers<[1], [0], [0], [1], [0, 0, 1, 1], [], []>} : vector<8x256xf32>, vector<256x8xf32>, vector<8x8xf32> -> vector<8x8xf32>
    %c0_18 = arith.constant 0 : index
    %c0_19 = arith.constant 0 : index
    %49 = vector.load %arg7[%c0_18, %c0_19] : memref<1x8xf32, #tpu.memory_space<vmem>>, vector<1x8xf32>
    %50 = vector.broadcast %49 : vector<1x8xf32> to vector<8x8xf32>
    %51 = arith.addf %48, %50 : vector<8x8xf32>
    %c0_20 = arith.constant 0 : index
    %c0_21 = arith.constant 0 : index
    %52 = vector.load %arg8[%c0_20, %c0_21] : memref<8x8xf32, #tpu.memory_space<vmem>>, vector<8x8xf32>
    tpu.vector_store %arg8[%c0_20, %c0_21], %51 {strides = array<i32>} : memref<8x8xf32, #tpu.memory_space<vmem>>, vector<8x8xf32>,
    return
  }
  func.func @transform_0(%arg0: i32) -> (i32, i32) {
    %c0_i32 = arith.constant 0 : i32
    %c0_i32_0 = arith.constant 0 : i32
    return %arg0, %c0_i32 : i32, i32
  }
  func.func @transform_1(%arg0: i32) -> (i32, i32) {
    %c0_i32 = arith.constant 0 : i32
    %c0_i32_0 = arith.constant 0 : i32
    %c0_i32_1 = arith.constant 0 : i32
    return %c0_i32, %c0_i32_0 : i32, i32
  }
  func.func @transform_2(%arg0: i32) -> (i32, i32) {
    %c0_i32 = arith.constant 0 : i32
    %c0_i32_0 = arith.constant 0 : i32
    %c0_i32_1 = arith.constant 0 : i32
    return %c0_i32, %c0_i32_0 : i32, i32
  }
  func.func @transform_3(%arg0: i32) -> (i32, i32) {
    %c0_i32 = arith.constant 0 : i32
    %c0_i32_0 = arith.constant 0 : i32
    %c0_i32_1 = arith.constant 0 : i32
    return %c0_i32, %c0_i32_0 : i32, i32
  }
  func.func @transform_4(%arg0: i32) -> (i32, i32) {
    %c0_i32 = arith.constant 0 : i32
    %c0_i32_0 = arith.constant 0 : i32
    %c0_i32_1 = arith.constant 0 : i32
    return %c0_i32, %c0_i32_0 : i32, i32
  }
  func.func @transform_5(%arg0: i32) -> (i32, i32) {
    %c0_i32 = arith.constant 0 : i32
    %c0_i32_0 = arith.constant 0 : i32
    %c0_i32_1 = arith.constant 0 : i32
    return %c0_i32, %c0_i32_0 : i32, i32
  }
  func.func @transform_6(%arg0: i32) -> (i32, i32) {
    %c0_i32 = arith.constant 0 : i32
    %c0_i32_0 = arith.constant 0 : i32
    %c0_i32_1 = arith.constant 0 : i32
    return %c0_i32, %c0_i32_0 : i32, i32
  }
  func.func @transform_7(%arg0: i32) -> (i32, i32) {
    %c0_i32 = arith.constant 0 : i32
    %c0_i32_0 = arith.constant 0 : i32
    return %arg0, %c0_i32 : i32, i32
  }
}

</mosaic_0001>

<bundles_post_ra>
// kernel: tpu_custom_call.1
= control target key start
LH: loop header
LB: loop body
LE: loop exit
PB: predicated region body
PF: predicated region fallthrough
CT: control target
= control target key end

     0   :  { %v444_v1 = vmov 0   ;;  %v445_v2 = vmov 2   ;;  %s675_s0 = inlined_call_operand.vmem [shape: f32[8,4], index: 0, kind: input, shape index: {}]   ;;  %s676_s1 = inlined_call_operand.vmem [shape: f32[4,64], index: 1, kind: input, shape index: {}]   ;;  %s677_s2 = inlined_call_operand.vmem [shape: f32[1,64], index: 2, kind: input, shape index: {}]   ;;  %s678_s3 = inlined_call_operand.vmem [shape: f32[64,256], index: 3, kind: input, shape index: {}]   ;;  %s679_s4 = inlined_call_operand.vmem [shape: f32[1,256], index: 4, kind: input, shape index: {}]   ;;  %s680_s5 = inlined_call_operand.vmem [shape: f32[256,8], index: 5, kind: input, shape index: {}]   ;;  %s681_s6 = inlined_call_operand.vmem [shape: f32[1,8], index: 6, kind: input, shape index: {}]   ;;  %s682_s7 = inlined_call_operand.hbm [shape: f32[8,8], index: 7, kind: output, shape index: {}]  }
   0x1   :  { %v27_v0 = vld [vmem:[%s675_s0] sm:$0xff]  ;;  %409 = vset.pattern.permute.xlu0 %v444_v1  ;;  %411 = vset.pattern.permute.xlu1 %v445_v2 }
   0x2   :  { %12 = vsyncpa [#allocation3], 0  ;;  %32 = vperm.xlu0 %409, %v27_v0   ;;  %58 = vperm.xlu1 %411, %v27_v0   ;;  %v446_v3 = vmov 1   ;;  %v447_v4 = vmov 3   ;;  %v82_v5 = vld [vmem:[%s678_s3 + $0x8] sm:$0xff]  ;;  %v84_v6 = vld [vmem:[%s678_s3 + $0x18] sm:$0xff]  ;;  %v35_v48 = vlaneseq }
   0x3   :  { %v355_v7 = vpack.c.bf16 %v84_v6, %v82_v5  ;;  %v81_v8 = vld [vmem:[%s678_s3] sm:$0xff]  ;;  %v83_v9 = vld [vmem:[%s678_s3 + $0x10] sm:$0xff]  ;;  %v86_v11 = vld [vmem:[%s678_s3 + $0x28] sm:$0xff]  ;;  %v448_v29 = vmov 0.0   ;;  %vm109_vm0 = vcmask 523264   ;;  %s449_s25 = smov [#allocation2]  }
   0x4   :  { %v357_v10 = vpack.c.bf16 %v83_v9, %v81_v8  ;;  %v88_v12 = vld [vmem:[%s678_s3 + $0x38] sm:$0xff]  ;;  %v85_v14 = vld [vmem:[%s678_s3 + $0x20] sm:$0xff]  ;;  %v87_v15 = vld [vmem:[%s678_s3 + $0x30] sm:$0xff]  ;;  %177 = vmatprep.mubr.f32.mxu0 %v448_v29  ;;  %v577_v49 = vshrl.u32 %v35_v48, 7  ;;  %s309_s26 = sshll.u32 %s449_s25, 4  ;;  %vm301_vm1 = vcmask 64512   ;;  %s310_s26 = int_to_ptr.vmem [resolvable:$true] %s309_s26 }
   0x5   :  { %356 = vmatprep.subr.bf16.mxu0 %v355_v7  ;;  %v359_v13 = vpack.c.bf16 %v88_v12, %v86_v11  ;;  %v361_v16 = vpack.c.bf16 %v87_v15, %v85_v14  ;;  %v90_v17 = vld [vmem:[%s678_s3 + $0x48] sm:$0xff]  ;;  %v92_v18 = vld [vmem:[%s678_s3 + $0x58] sm:$0xff]  ;;  %v89_v20 = vld [vmem:[%s678_s3 + $0x40] sm:$0xff]  ;;  %s420_s27 = scalar_lea.vmem %s310_s26, 128  ;;  %p425_p1 = scmp.lt.s32.totalorder %s310_s26, %s310_s26 }
   0x6   :  { %410 = vset.pattern.permute.xlu0 %v446_v3  ;;  %412 = vset.pattern.permute.xlu1 %v447_v4  ;;  %v363_v19 = vpack.c.bf16 %v92_v18, %v90_v17  ;;  %v91_v21 = vld [vmem:[%s678_s3 + $0x50] sm:$0xff]  ;;  %v94_v23 = vld [vmem:[%s678_s3 + $0x68] sm:$0xff]  ;;  %v96_v24 = vld [vmem:[%s678_s3 + $0x78] sm:$0xff]  ;;  %v37_v50 = vsub.s32 0, %v577_v49  ;;  %v53_v53 = vsub.s32 1, %v577_v49  ;;  %v63_v55 = vsub.s32 2, %v577_v49  ;;  %p421_p0 = scmp.ne.s32.totalorder %s310_s26, %s420_s27  ;;  %p426_p2 = scmp.lt.s32.totalorder %s420_s27, %s420_s27 }
   0x7   :  { %48 = vperm.xlu0 %410, %v27_v0   ;;  %68 = vperm.xlu1 %412, %v27_v0   ;;  %v365_v22 = vpack.c.bf16 %v91_v21, %v89_v20  ;;  %v367_v25 = vpack.c.bf16 %v96_v24, %v94_v23  ;;  %v93_v26 = vld [vmem:[%s678_s3 + $0x60] sm:$0xff]  ;;  %v95_v27 = vld [vmem:[%s678_s3 + $0x70] sm:$0xff]  ;;  %v209_v31 = vld [vmem:[%s680_s5 + $0x88] sm:$0xff]  ;;  %v73_v57 = vsub.s32 3, %v577_v49 }
   0x8   :  { %358 = vmatpush1.bf16.msra.mxu0 %v357_v10  ;;  %v369_v28 = vpack.c.bf16 %v95_v27, %v93_v26  ;;  %v208_v30 = vld [vmem:[%s680_s5 + $0x80] sm:$0xff]  ;;  %v193_v34 = vld [vmem:[%s680_s5 + $0x8] sm:$0xff]  ;;  %v210_v35 = vld [vmem:[%s680_s5 + $0x90] sm:$0xff]  ;;  %p427_p3 = por %p426_p2, %p425_p1 }
   0x9   :  { %360 = vmatprep.subr.bf16.mxu0 %v359_v13  ;;  %v192_v32 = vld [vmem:[%s680_s5] sm:$0xff]  ;;  %v371_v33 = vpack.c.bf16 %v209_v31, %v208_v30  ;;  %v211_v36 = vld [vmem:[%s680_s5 + $0x98] sm:$0xff]  ;;  %v194_v39 = vld [vmem:[%s680_s5 + $0x10] sm:$0xff] }
   0xa   :  { %v373_v37 = vpack.c.bf16 %v193_v34, %v192_v32  ;;  %v375_v38 = vpack.c.bf16 %v211_v36, %v210_v35  ;;  %v195_v40 = vld [vmem:[%s680_s5 + $0x18] sm:$0xff]  ;;  %v212_v41 = vld [vmem:[%s680_s5 + $0xa0] sm:$0xff]  ;;  %v213_v42 = vld [vmem:[%s680_s5 + $0xa8] sm:$0xff]  ;;  %p428_p4 = pnand %p427_p3, %p421_p0 }
   0xb   :  { %413 = vset.pattern.permute.xlu0 %v447_v4  ;;  %372 = vmatprep.subr.bf16.mxu1 %v371_v33  ;;  %v377_v43 = vpack.c.bf16 %v195_v40, %v194_v39  ;;  %v379_v44 = vpack.c.bf16 %v213_v42, %v212_v41  ;;  %v196_v45 = vld [vmem:[%s680_s5 + $0x20] sm:$0xff]  ;;  %v197_v46 = vld [vmem:[%s680_s5 + $0x28] sm:$0xff]  ;;  %v214_v12 = vld [vmem:[%s680_s5 + $0xb0] sm:$0xff] }
   0xc   :  { %362 = vmatpush1.bf16.msra.mxu0 %v361_v16  ;;  %374 = vmatpush3.bf16.msra.mxu1 %v373_v37  ;;  %v381_v47 = vpack.c.bf16 %v197_v46, %v196_v45  ;;  %v28_v51 = vld [vmem:[%s676_s1] sm:$0xf]  ;;  %v215_v13 = vld [vmem:[%s680_s5 + $0xb8] sm:$0xff]  ;;  %v198_v15 = vld [vmem:[%s680_s5 + $0x30] sm:$0xff] }
   0xd   :  { %364 = vmatprep.subr.bf16.mxu0 %v363_v19  ;;  %376 = vmatprep.subr.bf16.mxu1 %v375_v38  ;;  %v38_v52 = vrot.slane %v28_v51, %v37_v50  ;;  %v54_v59 = vrot.slane %v28_v51, %v53_v53  ;;  %v317_v60 = vld [vmem:[%s677_s2] ss:$0 sm:$0xff]  ;;  %v64_v61 = vrot.slane %v28_v51, %v63_v55  ;;  %v199_v16 = vld [vmem:[%s680_s5 + $0x38] sm:$0xff]  ;;  %v217_v19 = vld [vmem:[%s680_s5 + $0xc8] sm:$0xff] }
   0xe   :  { %v74_v62 = vrot.slane %v28_v51, %v73_v57  ;;  %v383_v14 = vpack.c.bf16 %v215_v13, %v214_v12  ;;  %v385_v17 = vpack.c.bf16 %v199_v16, %v198_v15  ;;  %v216_v18 = vld [vmem:[%s680_s5 + $0xc0] sm:$0xff]  ;;  %v218_v24 = vld [vmem:[%s680_s5 + $0xd0] sm:$0xff]  ;;  %v221_v31 = vld [vmem:[%s680_s5 + $0xe8] sm:$0xff] }
   0xf   :  { %v387_v20 = vpack.c.bf16 %v217_v19, %v216_v18  ;;  %v200_v21 = vld [vmem:[%s680_s5 + $0x40] sm:$0xff]  ;;  %v202_v27 = vld [vmem:[%s680_s5 + $0x50] sm:$0xff]  ;;  %v205_v34 = vld [vmem:[%s680_s5 + $0x68] sm:$0xff] }
  0x10   :  { %366 = vmatpush1.bf16.msra.mxu0 %v365_v22  ;;  %378 = vmatpush3.bf16.msra.mxu1 %v377_v43  ;;  %v201_v22 = vld [vmem:[%s680_s5 + $0x48] sm:$0xff]  ;;  %v220_v30 = vld [vmem:[%s680_s5 + $0xe0] sm:$0xff]  ;;  %v222_v36 = vld [vmem:[%s680_s5 + $0xf0] sm:$0xff] }
  0x11   :  { %368 = vmatprep.subr.bf16.mxu0 %v367_v25  ;;  %380 = vmatprep.subr.bf16.mxu1 %v379_v44  ;;  %v389_v23 = vpack.c.bf16 %v201_v22, %v200_v21  ;;  %v219_v25 = vld [vmem:[%s680_s5 + $0xd8] sm:$0xff]  ;;  %v395_v32 = vpack.c.bf16 %v221_v31, %v220_v30  ;;  %v204_v33 = vld [vmem:[%s680_s5 + $0x60] sm:$0xff]  ;;  %v206_v39 = vld [vmem:[%s680_s5 + $0x70] sm:$0xff] }
  0x12   :  { %v391_v26 = vpack.c.bf16 %v219_v25, %v218_v24  ;;  %v397_v35 = vpack.c.bf16 %v205_v34, %v204_v33  ;;  %v223_v37 = vld [vmem:[%s680_s5 + $0xf8] sm:$0xff]  ;;  %v97_v42 = vld [vmem:[%s679_s4] sm:$0x3] }
  0x13   :  { %v399_v38 = vpack.c.bf16 %v223_v37, %v222_v36  ;;  %v207_v40 = vld [vmem:[%s680_s5 + $0x78] sm:$0xff]  ;;  %v102_v43 = vrot.slane %v97_v42, %v37_v50  ;;  %v106_v44 = vrot.slane %v97_v42, %v53_v53  ;;  %v319_v49 = vld [vmem:[%s681_s6] ss:$0 sm:$0xff] }
  0x14   :  { %370 = vmatpush1.bf16.msra.mxu0 %v369_v28  ;;  %382 = vmatpush3.bf16.msra.mxu1 %v381_v47  ;;  %v203_v28 = vld [vmem:[%s680_s5 + $0x58] sm:$0xff]  ;;  %v401_v41 = vpack.c.bf16 %v207_v40, %v206_v39 }
  0x15   :  { %384 = vmatprep.subr.bf16.mxu1 %v383_v14  ;;  %v393_v29 = vpack.c.bf16 %v203_v28, %v202_v27 }
  0x18   :  { %386 = vmatpush3.bf16.msra.mxu1 %v385_v17 }
  0x19   :  { %388 = vmatprep.subr.bf16.mxu1 %v387_v20 }
  0x1c   :  { %390 = vmatpush3.bf16.msra.mxu1 %v389_v23 }
  0x1d   :  { %392 = vmatprep.subr.bf16.mxu1 %v391_v26 }
  0x20   :  { %394 = vmatpush3.bf16.msra.mxu1 %v393_v29 }
  0x21   :  { %396 = vmatprep.subr.bf16.mxu1 %v395_v32 }
  0x24   :  { %398 = vmatpush3.bf16.msra.mxu1 %v397_v35 }
  0x25   :  { %400 = vmatprep.subr.bf16.mxu1 %v399_v38 }
  0x28   :  { %402 = vmatpush3.bf16.msra.mxu1 %v401_v41 }
  0x81   :  { %v33_v54 = vpop.permute.xlu0 %32  ;;  %v59_v56 = vpop.permute.xlu1 %58 }
  0x82   :  { %v39_v58 = vmul.f32 %v38_v52, %v33_v54  ;;  %v65_v3 = vmul.f32 %v64_v61, %v59_v56 }
  0x84   :  { %v46_v1 = vadd.f32 %v317_v60, %v39_v58 }
  0x86   :  { %v49_v63 = vpop.permute.xlu0 %48  ;;  %v69_v0 = vpop.permute.xlu1 %68 }
  0x87   :  { %v55_v2 = vmul.f32 %v54_v59, %v49_v63  ;;  %v75_v5 = vmul.f32 %v74_v62, %v69_v0 }
  0x89   :  { %v56_v4 = vadd.f32 %v55_v2, %v46_v1 }
  0x8b   :  { %v66_v6 = vadd.f32 %v65_v3, %v56_v4 }
  0x8d   :  { %v76_v7 = vadd.f32 %v75_v5, %v66_v6 }
  0x8f   :  { %v77_v8 = vmul.f32 0.5, %v76_v7 }
  0x91   :  { %414 = vtanh.f32 %v77_v8 }
  0x9b   :  { %v415_v9 = vpop.eup %414 }
  0x9c   :  { %v79_v10 = vadd.f32 1.0, %v415_v9 }
  0x9e   :  { %v80_v11 = vmul.f32 0.5, %v79_v10 }
  0xa0   :  { %318 = vmatmul.mubr.msk.f32.vlgmr.msra.gmra.mrb[0].mxu0 %vm109_vm0, %v80_v11 }
 0x173   :  { %v179_v45 = vpop.f32.mrb[0].mxu0 }
 0x174   :  { %v180_v46 = vadd.f32 %v179_v45, %v102_v43  ;;  %v181_v47 = vpop.f32.mrb[1].mxu0 }
 0x175   :  { %v182_v48 = vadd.f32 %v181_v47, %v106_v44 }
 0x176   :  { %v184_v51 = vmul.f32 0.5, %v180_v46 }
 0x177   :  { %v185_v52 = vmul.f32 0.5, %v182_v48 }
 0x178   :  { %416 = vtanh.f32 %v184_v51 }
 0x179   :  { %418 = vtanh.f32 %v185_v52 }
 0x182   :  { %v417_v54 = vpop.eup %416 }
 0x183   :  { %v419_v55 = vpop.eup %418  ;;  %v188_v56 = vadd.f32 1.0, %v417_v54 }
 0x184   :  { %v189_v57 = vadd.f32 1.0, %v419_v55 }
 0x185   :  { %v190_v59 = vmul.f32 0.5, %v188_v56 }
 0x186   :  { %v191_v58 = vmul.f32 0.5, %v189_v57 }
 0x188   :  { %295 = vmatprep.mubr.f32.mxu1 %v191_v58 }
 0x189   :  { %296 = vmatmul.mubr.f32.vlgmr.msra.gmra.mrb[0].mxu1 %v190_v59 }
 0x25c   :  { %v352_v50 = vpop.f32.mrb[0].mxu1 }
 0x25d   :  { %v353_v53 = vpop.f32.mrb[1].mxu1 }
 0x25e   :  { %v354_v60 = vadd.f32 %v353_v53, %v352_v50 }
 0x260   :  { %v298_v61 = vadd.f32 %v354_v60, %v319_v49 }
 0x262   :  { %302 = vst.msk [vmem:[#allocation2] sm:$0xff] %vm301_vm1, %v298_v61 }
 0x263   :  { %431 = shalt.err (!%p428_p4)
}
 0x264   :  { %s432_s29 = scalar_lea.hbm %s682_s7, 128 }
 0x265   :  { %p433_p5 = scmp.ne.s32.totalorder %s682_s7, %s432_s29  ;;  %p436_p6 = scmp.lt.u32.totalorder %s432_s29, %s682_s7 }
 0x267   :  { %p438_p7 = pnand %p436_p6, %p433_p5 }
 0x269   :  { %441 = shalt.err (!%p438_p7)
}
 0x26a   :  { %312 = dma.vmem_to_hbm [thread:$0]  %s310_s26, 128, %s682_s7, [#allocation3]  }
 0x26b   :  { %442 = dma.done.wait [#allocation3], 128  }
 0x26c   :  { %443 = vsyncadd [#allocation3], 4294967168 }
 0x26d   :  { %316 = vsyncpa [#allocation3], 1 }

</bundles_post_ra>
